<compile_context>
chip_gen: v7x
topology: tpu7x:2x2x1
jax: 0.10.0
libtpu: 0.0.40
codegen_flags: <defaults>
</compile_context>

<pallas_src>
import functools

import jax
import jax.numpy as jnp
from jax.experimental import pallas as pl
from jax.experimental.pallas import tpu as pltpu


# ----------------------------------------------------------------------------
# Kernel body
# ----------------------------------------------------------------------------
def _head_kernel(x_ref, w1_ref, b1_ref, g_ref, beta_ref, w2_ref, b2_ref, o_ref,
                 *, eps, inv_h):
    # dense: cast the activation tile to the weight dtype so bf16 weights hit
    # the MXU at native rate (f32 matmuls are multi-pass); f32 accumulation.
    x = x_ref[...].astype(w1_ref.dtype)
    h = jnp.dot(x, w1_ref[...], preferred_element_type=jnp.float32)
    h = h + b1_ref[...].astype(jnp.float32)                      # (tm, H)

    # dropout -> identity (inference mode)

    # gelu (GPT-2 tanh approximation), VALU-trimmed:
    #   c*(h + 0.044715*h^3) == h*(c + (c*0.044715)*h^2); 0.5 folded into blend.
    c = 0.7978845608028654  # sqrt(2/pi)
    h2 = h * h
    t = jnp.tanh(h * (c + (c * 0.044715) * h2))                  # tanh -> EUP
    h = h * (0.5 + 0.5 * t)

    # LayerNorm over the hidden axis (eps=1e-12); scaled sums, no divides.
    mean = jnp.sum(h, axis=-1, keepdims=True) * inv_h
    cen = h - mean
    var = jnp.sum(cen * cen, axis=-1, keepdims=True) * inv_h
    hn = cen * jax.lax.rsqrt(var + eps)                          # rsqrt -> EUP
    hn = hn * g_ref[...].astype(jnp.float32) + beta_ref[...].astype(jnp.float32)

    # dropout -> identity (inference mode)

    # decoder: LN result cast to the weight dtype for the MXU, f32 accumulation.
    out = jnp.dot(hn.astype(w2_ref.dtype), w2_ref[...],
                  preferred_element_type=jnp.float32)
    out = out + b2_ref[...].astype(jnp.float32)                  # (tm, n_out_p)

    o_ref[...] = out.astype(o_ref.dtype)


# ----------------------------------------------------------------------------
# Wrapper
# ----------------------------------------------------------------------------
def _round_up(a, b):
    return ((a + b - 1) // b) * b


def _physical_vmem_bytes():
    # Query per-core VMEM; fall back to the smallest generation (v7x, 64 MiB).
    try:
        return int(pltpu.get_tpu_info().vmem_capacity_bytes)
    except Exception:
        return 64 * 1024 * 1024


def lm_prediction_head(features, params, *, eps=1e-12, tm=512):
    """features: (B, S, H) or (N, H). Returns logits of shape (..., n_out)."""
    orig_shape = features.shape
    H = orig_shape[-1]
    x = features.reshape(-1, H)                                  # (N, H)
    N = x.shape[0]

    w1 = params["w_dense"]        # (H, H)   -> x @ w1
    b1 = params["b_dense"]        # (1, H)
    gamma = params["ln_gamma"]    # (1, H)
    beta = params["ln_beta"]      # (1, H)
    w2 = params["w_dec"]          # (H, n_out)
    b2 = params["b_dec"]          # (1, n_out)  (tied bias)
    n_out = w2.shape[1]

    # Lane-dense decoder output: pad n_out up to a multiple of 128 so output
    # stores are full vst's, not masked partial stores. Sliced off afterwards.
    n_out_p = _round_up(max(n_out, 128), 128)
    if n_out_p != n_out:
        w2 = jnp.pad(w2, ((0, 0), (0, n_out_p - n_out)))
        b2 = jnp.pad(b2, ((0, 0), (0, n_out_p - n_out)))

    xsz = jnp.dtype(x.dtype).itemsize
    wsz = jnp.dtype(w1.dtype).itemsize
    osz = jnp.dtype(features.dtype).itemsize
    sub = 8  # sublane granularity for block shapes

    # Row tile: big enough to amortize the ~0.35us/step overhead, but
    #   * at least 2 grid steps when N permits (v7x megacore: both TCs busy),
    #   * NO HBM row padding — Pallas masks the ragged last block (all math
    #     here is row-independent, so garbage rows are harmless and their
    #     output writes are dropped).
    tm = max(sub, _round_up(min(tm, max(N, 1)), sub))
    if N > sub:
        tm = min(tm, _round_up(pl.cdiv(N, 2), sub))

    # VMEM accounting: resident params (single-buffered) + double-buffered
    # x/out tiles + headroom, capped at ~85% of physical VMEM per generation.
    phys_vmem = _physical_vmem_bytes()
    cap = int(phys_vmem * 0.85)
    resident = (H * H + 3 * H + H * n_out_p + n_out_p) * wsz
    headroom = 2 * 1024 * 1024

    def _streamed(t):
        return 2 * (t * H * xsz + t * n_out_p * osz)

    while tm > sub and resident + _streamed(tm) + headroom > cap:
        tm = max(sub, _round_up(tm // 2, sub))

    grid = (pl.cdiv(N, tm),)
    kernel = functools.partial(_head_kernel, eps=eps, inv_h=1.0 / H)

    def _call(single_buffer_params):
        # Constant-index params never change across grid steps -> 1 buffer.
        const_kw = (dict(pipeline_mode=pl.Buffered(1))
                    if single_buffer_params else {})
        res = resident if single_buffer_params else 2 * resident
        vmem_limit = int(min(max(res + _streamed(tm) + headroom,
                                 16 * 1024 * 1024), cap))
        return pl.pallas_call(
            kernel,
            out_shape=jax.ShapeDtypeStruct((N, n_out_p), features.dtype),
            grid_spec=pltpu.PrefetchScalarGridSpec(
                num_scalar_prefetch=0,
                grid=grid,
                in_specs=[
                    # Activations: tiled over rows -> pipelined DMA.
                    pl.BlockSpec((tm, H), lambda i: (i, 0)),               # x
                    # Weights / params: constant block index -> VMEM-resident.
                    pl.BlockSpec((H, H), lambda i: (0, 0), **const_kw),    # w_dense
                    pl.BlockSpec((1, H), lambda i: (0, 0), **const_kw),    # b_dense
                    pl.BlockSpec((1, H), lambda i: (0, 0), **const_kw),    # ln_gamma
                    pl.BlockSpec((1, H), lambda i: (0, 0), **const_kw),    # ln_beta
                    pl.BlockSpec((H, n_out_p), lambda i: (0, 0), **const_kw),  # w_dec
                    pl.BlockSpec((1, n_out_p), lambda i: (0, 0), **const_kw),  # b_dec
                ],
                out_specs=pl.BlockSpec((tm, n_out_p), lambda i: (i, 0)),
            ),
            compiler_params=pltpu.CompilerParams(
                dimension_semantics=("parallel",),   # row tiles -> megacore
                vmem_limit_bytes=vmem_limit),
        )(x, w1, b1, gamma, beta, w2, b2)

    try:
        out = _call(single_buffer_params=True)
    except Exception:
        # Fallback: default double-buffering if Buffered(1) is not accepted.
        out = _call(single_buffer_params=False)

    out = out[:, :n_out]
    return out.reshape(orig_shape[:-1] + (n_out,))


# ----------------------------------------------------------------------------
# Params / reference
# ----------------------------------------------------------------------------
def init_params(key, n_embd, n_out=2, dtype=jnp.float32):
    k1, k2, k3 = jax.random.split(key, 3)
    scale = 1.0 / jnp.sqrt(jnp.float32(n_embd))
    return {
        # stored pre-transposed as (in, out)
        "w_dense": (jax.random.normal(k1, (n_embd, n_embd)) * scale).astype(dtype),
        "b_dense": (jax.random.normal(k2, (1, n_embd)) * 0.02).astype(dtype),
        "ln_gamma": jnp.ones((1, n_embd), dtype),
        "ln_beta": jnp.zeros((1, n_embd), dtype),
        "w_dec": (jax.random.normal(k3, (n_embd, n_out)) * scale).astype(dtype),
        # decoder.bias is tied to self.bias = zeros(n_out)
        "b_dec": jnp.zeros((1, n_out), dtype),
    }


def _reference(features, params, eps=1e-12):
    x = features.astype(jnp.float32)
    h = x @ params["w_dense"].astype(jnp.float32) + params["b_dense"].astype(jnp.float32)
    c = 0.7978845608028654
    h = 0.5 * h * (1.0 + jnp.tanh(c * (h + 0.044715 * h ** 3)))
    mean = h.mean(-1, keepdims=True)
    var = ((h - mean) ** 2).mean(-1, keepdims=True)
    hn = (h - mean) * jax.lax.rsqrt(var + eps)
    hn = hn * params["ln_gamma"].astype(jnp.float32) + params["ln_beta"].astype(jnp.float32)
    return (hn @ params["w_dec"].astype(jnp.float32) + params["b_dec"].astype(jnp.float32)
            ).astype(features.dtype)


# ----------------------------------------------------------------------------
# Demo / correctness check
# ----------------------------------------------------------------------------
if __name__ == "__main__":
    key = jax.random.PRNGKey(0)
    kx, kp = jax.random.split(key)

    batch, seq, n_embd, n_out = 2, 8, 32, 2
    features = jax.random.normal(kx, (batch, seq, n_embd), jnp.float32)

    # f32 weights: exact-path correctness check against the pure-JAX reference.
    # (N = 16 rows -> tm clamps to 8 -> grid=(2,), exercising the pipelined
    #  multi-step path and the padded lane-dense output.)
    params_f32 = init_params(kp, n_embd, n_out, dtype=jnp.float32)
    out = jax.block_until_ready(lm_prediction_head(features, params_f32))
    ref = _reference(features, params_f32)
    assert out.shape == (batch, seq, n_out), out.shape
    assert jnp.allclose(out, ref, atol=2e-4, rtol=2e-4), \
        float(jnp.max(jnp.abs(out - ref)))

    # bf16 weights: exercises the native-rate bf16 MXU path (loose sanity check;
    # differences vs. the f32 reference come from weight quantization).
    params_bf16 = jax.tree_util.tree_map(
        lambda p: p.astype(jnp.bfloat16), params_f32)
    out_bf = jax.block_until_ready(lm_prediction_head(features, params_bf16))
    assert out_bf.shape == (batch, seq, n_out), out_bf.shape
    out_bf32 = out_bf.astype(jnp.float32)
    assert bool(jnp.all(jnp.isfinite(out_bf32)))
    assert float(jnp.max(jnp.abs(out_bf32 - ref.astype(jnp.float32)))) < 0.5

    print("KERNEL_OK")
</pallas_src>

<mosaic_0001>
module attributes {stable_mosaic.version = 11 : i64} {
  func.func @_head_kernel(%arg0: i32, %arg1: memref<8x32xf32, #tpu.memory_space<vmem>>, %arg2: memref<32x32xf32, #tpu.memory_space<vmem>>, %arg3: memref<1x32xf32, #tpu.memory_space<vmem>>, %arg4: memref<1x32xf32, #tpu.memory_space<vmem>>, %arg5: memref<1x32xf32, #tpu.memory_space<vmem>>, %arg6: memref<32x128xf32, #tpu.memory_space<vmem>>, %arg7: memref<1x128xf32, #tpu.memory_space<vmem>>, %arg8: memref<8x128xf32, #tpu.memory_space<vmem>>) attributes {dimension_semantics = [#tpu.dimension_semantics<parallel>], iteration_bounds = array<i64: 2>, scalar_prefetch = 0 : i64, scratch_operands = 0 : i64, tpu.core_type = #tpu.core_type<tc>, window_params = [{transform_indices = @transform_0, window_bounds = array<i64: 8, 32>}, {pipeline_mode = #tpu.pipeline_mode<synchronous>, transform_indices = @transform_1, window_bounds = array<i64: 32, 32>}, {pipeline_mode = #tpu.pipeline_mode<synchronous>, transform_indices = @transform_2, window_bounds = array<i64: 1, 32>}, {pipeline_mode = #tpu.pipeline_mode<synchronous>, transform_indices = @transform_3, window_bounds = array<i64: 1, 32>}, {pipeline_mode = #tpu.pipeline_mode<synchronous>, transform_indices = @transform_4, window_bounds = array<i64: 1, 32>}, {pipeline_mode = #tpu.pipeline_mode<synchronous>, transform_indices = @transform_5, window_bounds = array<i64: 32, 128>}, {pipeline_mode = #tpu.pipeline_mode<synchronous>, transform_indices = @transform_6, window_bounds = array<i64: 1, 128>}, {transform_indices = @transform_7, window_bounds = array<i64: 8, 128>}]} {
    %c0 = arith.constant 0 : index
    %c0_0 = arith.constant 0 : index
    %0 = vector.load %arg1[%c0, %c0_0] : memref<8x32xf32, #tpu.memory_space<vmem>>, vector<8x32xf32>
    %c0_1 = arith.constant 0 : index
    %c0_2 = arith.constant 0 : index
    %1 = vector.load %arg2[%c0_1, %c0_2] : memref<32x32xf32, #tpu.memory_space<vmem>>, vector<32x32xf32>
    %cst = arith.constant dense<0.000000e+00> : vector<8x32xf32>
    %2 = tpu.matmul %0, %1, %cst {dimension_numbers = #tpu.dot_dimension_numbers<[1], [0], [0], [1], [0, 0, 1, 1], [], []>} : vector<8x32xf32>, vector<32x32xf32>, vector<8x32xf32> -> vector<8x32xf32>
    %c0_3 = arith.constant 0 : index
    %c0_4 = arith.constant 0 : index
    %3 = vector.load %arg3[%c0_3, %c0_4] : memref<1x32xf32, #tpu.memory_space<vmem>>, vector<1x32xf32>
    %4 = vector.broadcast %3 : vector<1x32xf32> to vector<8x32xf32>
    %5 = arith.addf %2, %4 : vector<8x32xf32>
    %6 = arith.mulf %5, %5 : vector<8x32xf32>
    %cst_5 = arith.constant 0.0356774069 : f32
    %7 = vector.broadcast %cst_5 : f32 to vector<8x32xf32>
    %8 = arith.mulf %7, %6 : vector<8x32xf32>
    %cst_6 = arith.constant 0.797884583 : f32
    %9 = vector.broadcast %cst_6 : f32 to vector<8x32xf32>
    %10 = arith.addf %9, %8 : vector<8x32xf32>
    %11 = arith.mulf %5, %10 : vector<8x32xf32>
    %12 = math.tanh %11 : vector<8x32xf32>
    %cst_7 = arith.constant 5.000000e-01 : f32
    %13 = vector.broadcast %cst_7 : f32 to vector<8x32xf32>
    %14 = arith.mulf %13, %12 : vector<8x32xf32>
    %cst_8 = arith.constant 5.000000e-01 : f32
    %15 = vector.broadcast %cst_8 : f32 to vector<8x32xf32>
    %16 = arith.addf %15, %14 : vector<8x32xf32>
    %17 = arith.mulf %5, %16 : vector<8x32xf32>
    %cst_9 = arith.constant dense<0.000000e+00> : vector<8xf32>
    %18 = vector.multi_reduction <add>, %17, %cst_9 [1] : vector<8x32xf32> to vector<8xf32>
    %19 = vector.shape_cast %18 : vector<8xf32> to vector<8x1xf32>
    %cst_10 = arith.constant 3.125000e-02 : f32
    %20 = vector.broadcast %cst_10 : f32 to vector<8x1xf32>
    %21 = arith.mulf %19, %20 : vector<8x1xf32>
    %22 = vector.broadcast %21 : vector<8x1xf32> to vector<8x32xf32>
    %23 = arith.subf %17, %22 : vector<8x32xf32>
    %24 = arith.mulf %23, %23 : vector<8x32xf32>
    %cst_11 = arith.constant dense<0.000000e+00> : vector<8xf32>
    %25 = vector.multi_reduction <add>, %24, %cst_11 [1] : vector<8x32xf32> to vector<8xf32>
    %26 = vector.shape_cast %25 : vector<8xf32> to vector<8x1xf32>
    %cst_12 = arith.constant 3.125000e-02 : f32
    %27 = vector.broadcast %cst_12 : f32 to vector<8x1xf32>
    %28 = arith.mulf %26, %27 : vector<8x1xf32>
    %cst_13 = arith.constant 9.99999996E-13 : f32
    %29 = vector.broadcast %cst_13 : f32 to vector<8x1xf32>
    %30 = arith.addf %28, %29 : vector<8x1xf32>
    %31 = math.rsqrt %30 : vector<8x1xf32>
    %32 = vector.broadcast %31 : vector<8x1xf32> to vector<8x32xf32>
    %33 = arith.mulf %23, %32 : vector<8x32xf32>
    %c0_14 = arith.constant 0 : index
    %c0_15 = arith.constant 0 : index
    %34 = vector.load %arg4[%c0_14, %c0_15] : memref<1x32xf32, #tpu.memory_space<vmem>>, vector<1x32xf32>
    %35 = vector.broadcast %34 : vector<1x32xf32> to vector<8x32xf32>
    %36 = arith.mulf %33, %35 : vector<8x32xf32>
    %c0_16 = arith.constant 0 : index
    %c0_17 = arith.constant 0 : index
    %37 = vector.load %arg5[%c0_16, %c0_17] : memref<1x32xf32, #tpu.memory_space<vmem>>, vector<1x32xf32>
    %38 = vector.broadcast %37 : vector<1x32xf32> to vector<8x32xf32>
    %39 = arith.addf %36, %38 : vector<8x32xf32>
    %c0_18 = arith.constant 0 : index
    %c0_19 = arith.constant 0 : index
    %40 = vector.load %arg6[%c0_18, %c0_19] : memref<32x128xf32, #tpu.memory_space<vmem>>, vector<32x128xf32>
    %cst_20 = arith.constant dense<0.000000e+00> : vector<8x128xf32>
    %41 = tpu.matmul %39, %40, %cst_20 {dimension_numbers = #tpu.dot_dimension_numbers<[1], [0], [0], [1], [0, 0, 1, 1], [], []>} : vector<8x32xf32>, vector<32x128xf32>, vector<8x128xf32> -> vector<8x128xf32>
    %c0_21 = arith.constant 0 : index
    %c0_22 = arith.constant 0 : index
    %42 = vector.load %arg7[%c0_21, %c0_22] : memref<1x128xf32, #tpu.memory_space<vmem>>, vector<1x128xf32>
    %43 = vector.broadcast %42 : vector<1x128xf32> to vector<8x128xf32>
    %44 = arith.addf %41, %43 : vector<8x128xf32>
    %c0_23 = arith.constant 0 : index
    %c0_24 = arith.constant 0 : index
    %45 = vector.load %arg8[%c0_23, %c0_24] : memref<8x128xf32, #tpu.memory_space<vmem>>, vector<8x128xf32>
    tpu.vector_store %arg8[%c0_23, %c0_24], %44 {strides = array<i32>} : memref<8x128xf32, #tpu.memory_space<vmem>>, vector<8x128xf32>,
    return
  }
  func.func @transform_0(%arg0: i32) -> (i32, i32) {
    %c0_i32 = arith.constant 0 : i32
    %c0_i32_0 = arith.constant 0 : i32
    return %arg0, %c0_i32 : i32, i32
  }
  func.func @transform_1(%arg0: i32) -> (i32, i32) {
    %c0_i32 = arith.constant 0 : i32
    %c0_i32_0 = arith.constant 0 : i32
    %c0_i32_1 = arith.constant 0 : i32
    return %c0_i32, %c0_i32_0 : i32, i32
  }
  func.func @transform_2(%arg0: i32) -> (i32, i32) {
    %c0_i32 = arith.constant 0 : i32
    %c0_i32_0 = arith.constant 0 : i32
    %c0_i32_1 = arith.constant 0 : i32
    return %c0_i32, %c0_i32_0 : i32, i32
  }
  func.func @transform_3(%arg0: i32) -> (i32, i32) {
    %c0_i32 = arith.constant 0 : i32
    %c0_i32_0 = arith.constant 0 : i32
    %c0_i32_1 = arith.constant 0 : i32
    return %c0_i32, %c0_i32_0 : i32, i32
  }
  func.func @transform_4(%arg0: i32) -> (i32, i32) {
    %c0_i32 = arith.constant 0 : i32
    %c0_i32_0 = arith.constant 0 : i32
    %c0_i32_1 = arith.constant 0 : i32
    return %c0_i32, %c0_i32_0 : i32, i32
  }
  func.func @transform_5(%arg0: i32) -> (i32, i32) {
    %c0_i32 = arith.constant 0 : i32
    %c0_i32_0 = arith.constant 0 : i32
    %c0_i32_1 = arith.constant 0 : i32
    return %c0_i32, %c0_i32_0 : i32, i32
  }
  func.func @transform_6(%arg0: i32) -> (i32, i32) {
    %c0_i32 = arith.constant 0 : i32
    %c0_i32_0 = arith.constant 0 : i32
    %c0_i32_1 = arith.constant 0 : i32
    return %c0_i32, %c0_i32_0 : i32, i32
  }
  func.func @transform_7(%arg0: i32) -> (i32, i32) {
    %c0_i32 = arith.constant 0 : i32
    %c0_i32_0 = arith.constant 0 : i32
    return %arg0, %c0_i32 : i32, i32
  }
}

module attributes {stable_mosaic.version = 11 : i64} {
  func.func @_head_kernel(%arg0: i32, %arg1: memref<8x32xf32, #tpu.memory_space<vmem>>, %arg2: memref<32x32xf32, #tpu.memory_space<vmem>>, %arg3: memref<1x32xf32, #tpu.memory_space<vmem>>, %arg4: memref<1x32xf32, #tpu.memory_space<vmem>>, %arg5: memref<1x32xf32, #tpu.memory_space<vmem>>, %arg6: memref<32x128xf32, #tpu.memory_space<vmem>>, %arg7: memref<1x128xf32, #tpu.memory_space<vmem>>, %arg8: memref<8x128xf32, #tpu.memory_space<vmem>>) attributes {dimension_semantics = [#tpu.dimension_semantics<parallel>], iteration_bounds = array<i64: 2>, scalar_prefetch = 0 : i64, scratch_operands = 0 : i64, tpu.core_type = #tpu.core_type<tc>, window_params = [{transform_indices = @transform_0, window_bounds = array<i64: 8, 32>}, {pipeline_mode = #tpu.pipeline_mode<synchronous>, transform_indices = @transform_1, window_bounds = array<i64: 32, 32>}, {pipeline_mode = #tpu.pipeline_mode<synchronous>, transform_indices = @transform_2, window_bounds = array<i64: 1, 32>}, {pipeline_mode = #tpu.pipeline_mode<synchronous>, transform_indices = @transform_3, window_bounds = array<i64: 1, 32>}, {pipeline_mode = #tpu.pipeline_mode<synchronous>, transform_indices = @transform_4, window_bounds = array<i64: 1, 32>}, {pipeline_mode = #tpu.pipeline_mode<synchronous>, transform_indices = @transform_5, window_bounds = array<i64: 32, 128>}, {pipeline_mode = #tpu.pipeline_mode<synchronous>, transform_indices = @transform_6, window_bounds = array<i64: 1, 128>}, {transform_indices = @transform_7, window_bounds = array<i64: 8, 128>}]} {
    %c0 = arith.constant 0 : index
    %c0_0 = arith.constant 0 : index
    %0 = vector.load %arg1[%c0, %c0_0] : memref<8x32xf32, #tpu.memory_space<vmem>>, vector<8x32xf32>
    %c0_1 = arith.constant 0 : index
    %c0_2 = arith.constant 0 : index
    %1 = vector.load %arg2[%c0_1, %c0_2] : memref<32x32xf32, #tpu.memory_space<vmem>>, vector<32x32xf32>
    %cst = arith.constant dense<0.000000e+00> : vector<8x32xf32>
    %2 = tpu.matmul %0, %1, %cst {dimension_numbers = #tpu.dot_dimension_numbers<[1], [0], [0], [1], [0, 0, 1, 1], [], []>} : vector<8x32xf32>, vector<32x32xf32>, vector<8x32xf32> -> vector<8x32xf32>
    %c0_3 = arith.constant 0 : index
    %c0_4 = arith.constant 0 : index
    %3 = vector.load %arg3[%c0_3, %c0_4] : memref<1x32xf32, #tpu.memory_space<vmem>>, vector<1x32xf32>
    %4 = vector.broadcast %3 : vector<1x32xf32> to vector<8x32xf32>
    %5 = arith.addf %2, %4 : vector<8x32xf32>
    %6 = arith.mulf %5, %5 : vector<8x32xf32>
    %cst_5 = arith.constant 0.0356774069 : f32
    %7 = vector.broadcast %cst_5 : f32 to vector<8x32xf32>
    %8 = arith.mulf %7, %6 : vector<8x32xf32>
    %cst_6 = arith.constant 0.797884583 : f32
    %9 = vector.broadcast %cst_6 : f32 to vector<8x32xf32>
    %10 = arith.addf %9, %8 : vector<8x32xf32>
    %11 = arith.mulf %5, %10 : vector<8x32xf32>
    %12 = math.tanh %11 : vector<8x32xf32>
    %cst_7 = arith.constant 5.000000e-01 : f32
    %13 = vector.broadcast %cst_7 : f32 to vector<8x32xf32>
    %14 = arith.mulf %13, %12 : vector<8x32xf32>
    %cst_8 = arith.constant 5.000000e-01 : f32
    %15 = vector.broadcast %cst_8 : f32 to vector<8x32xf32>
    %16 = arith.addf %15, %14 : vector<8x32xf32>
    %17 = arith.mulf %5, %16 : vector<8x32xf32>
    %cst_9 = arith.constant dense<0.000000e+00> : vector<8xf32>
    %18 = vector.multi_reduction <add>, %17, %cst_9 [1] : vector<8x32xf32> to vector<8xf32>
    %19 = vector.shape_cast %18 : vector<8xf32> to vector<8x1xf32>
    %cst_10 = arith.constant 3.125000e-02 : f32
    %20 = vector.broadcast %cst_10 : f32 to vector<8x1xf32>
    %21 = arith.mulf %19, %20 : vector<8x1xf32>
    %22 = vector.broadcast %21 : vector<8x1xf32> to vector<8x32xf32>
    %23 = arith.subf %17, %22 : vector<8x32xf32>
    %24 = arith.mulf %23, %23 : vector<8x32xf32>
    %cst_11 = arith.constant dense<0.000000e+00> : vector<8xf32>
    %25 = vector.multi_reduction <add>, %24, %cst_11 [1] : vector<8x32xf32> to vector<8xf32>
    %26 = vector.shape_cast %25 : vector<8xf32> to vector<8x1xf32>
    %cst_12 = arith.constant 3.125000e-02 : f32
    %27 = vector.broadcast %cst_12 : f32 to vector<8x1xf32>
    %28 = arith.mulf %26, %27 : vector<8x1xf32>
    %cst_13 = arith.constant 9.99999996E-13 : f32
    %29 = vector.broadcast %cst_13 : f32 to vector<8x1xf32>
    %30 = arith.addf %28, %29 : vector<8x1xf32>
    %31 = math.rsqrt %30 : vector<8x1xf32>
    %32 = vector.broadcast %31 : vector<8x1xf32> to vector<8x32xf32>
    %33 = arith.mulf %23, %32 : vector<8x32xf32>
    %c0_14 = arith.constant 0 : index
    %c0_15 = arith.constant 0 : index
    %34 = vector.load %arg4[%c0_14, %c0_15] : memref<1x32xf32, #tpu.memory_space<vmem>>, vector<1x32xf32>
    %35 = vector.broadcast %34 : vector<1x32xf32> to vector<8x32xf32>
    %36 = arith.mulf %33, %35 : vector<8x32xf32>
    %c0_16 = arith.constant 0 : index
    %c0_17 = arith.constant 0 : index
    %37 = vector.load %arg5[%c0_16, %c0_17] : memref<1x32xf32, #tpu.memory_space<vmem>>, vector<1x32xf32>
    %38 = vector.broadcast %37 : vector<1x32xf32> to vector<8x32xf32>
    %39 = arith.addf %36, %38 : vector<8x32xf32>
    %c0_18 = arith.constant 0 : index
    %c0_19 = arith.constant 0 : index
    %40 = vector.load %arg6[%c0_18, %c0_19] : memref<32x128xf32, #tpu.memory_space<vmem>>, vector<32x128xf32>
    %cst_20 = arith.constant dense<0.000000e+00> : vector<8x128xf32>
    %41 = tpu.matmul %39, %40, %cst_20 {dimension_numbers = #tpu.dot_dimension_numbers<[1], [0], [0], [1], [0, 0, 1, 1], [], []>} : vector<8x32xf32>, vector<32x128xf32>, vector<8x128xf32> -> vector<8x128xf32>
    %c0_21 = arith.constant 0 : index
    %c0_22 = arith.constant 0 : index
    %42 = vector.load %arg7[%c0_21, %c0_22] : memref<1x128xf32, #tpu.memory_space<vmem>>, vector<1x128xf32>
    %43 = vector.broadcast %42 : vector<1x128xf32> to vector<8x128xf32>
    %44 = arith.addf %41, %43 : vector<8x128xf32>
    %c0_23 = arith.constant 0 : index
    %c0_24 = arith.constant 0 : index
    %45 = vector.load %arg8[%c0_23, %c0_24] : memref<8x128xf32, #tpu.memory_space<vmem>>, vector<8x128xf32>
    tpu.vector_store %arg8[%c0_23, %c0_24], %44 {strides = array<i32>} : memref<8x128xf32, #tpu.memory_space<vmem>>, vector<8x128xf32>,
    return
  }
  func.func @transform_0(%arg0: i32) -> (i32, i32) {
    %c0_i32 = arith.constant 0 : i32
    %c0_i32_0 = arith.constant 0 : i32
    return %arg0, %c0_i32 : i32, i32
  }
  func.func @transform_1(%arg0: i32) -> (i32, i32) {
    %c0_i32 = arith.constant 0 : i32
    %c0_i32_0 = arith.constant 0 : i32
    %c0_i32_1 = arith.constant 0 : i32
    return %c0_i32, %c0_i32_0 : i32, i32
  }
  func.func @transform_2(%arg0: i32) -> (i32, i32) {
    %c0_i32 = arith.constant 0 : i32
    %c0_i32_0 = arith.constant 0 : i32
    %c0_i32_1 = arith.constant 0 : i32
    return %c0_i32, %c0_i32_0 : i32, i32
  }
  func.func @transform_3(%arg0: i32) -> (i32, i32) {
    %c0_i32 = arith.constant 0 : i32
    %c0_i32_0 = arith.constant 0 : i32
    %c0_i32_1 = arith.constant 0 : i32
    return %c0_i32, %c0_i32_0 : i32, i32
  }
  func.func @transform_4(%arg0: i32) -> (i32, i32) {
    %c0_i32 = arith.constant 0 : i32
    %c0_i32_0 = arith.constant 0 : i32
    %c0_i32_1 = arith.constant 0 : i32
    return %c0_i32, %c0_i32_0 : i32, i32
  }
  func.func @transform_5(%arg0: i32) -> (i32, i32) {
    %c0_i32 = arith.constant 0 : i32
    %c0_i32_0 = arith.constant 0 : i32
    %c0_i32_1 = arith.constant 0 : i32
    return %c0_i32, %c0_i32_0 : i32, i32
  }
  func.func @transform_6(%arg0: i32) -> (i32, i32) {
    %c0_i32 = arith.constant 0 : i32
    %c0_i32_0 = arith.constant 0 : i32
    %c0_i32_1 = arith.constant 0 : i32
    return %c0_i32, %c0_i32_0 : i32, i32
  }
  func.func @transform_7(%arg0: i32) -> (i32, i32) {
    %c0_i32 = arith.constant 0 : i32
    %c0_i32_0 = arith.constant 0 : i32
    return %arg0, %c0_i32 : i32, i32
  }
}

</mosaic_0001>

<bundles_post_ra>
// kernel: tpu_custom_call.1
= control target key start
LH: loop header
LB: loop body
LE: loop exit
PB: predicated region body
PF: predicated region fallthrough
CT: control target
= control target key end

     0   :  { %12 = vsyncpa [#allocation3], 0  ;;  %s1232_s0 = inlined_call_operand.hbm [shape: f32[16,32], index: 0, kind: input, shape index: {}]   ;;  %s1233_s1 = inlined_call_operand.hbm [shape: f32[32,32], index: 1, kind: input, shape index: {}]   ;;  %s1234_s2 = inlined_call_operand.vmem [shape: f32[1,32], index: 2, kind: input, shape index: {}]   ;;  %s1235_s3 = inlined_call_operand.vmem [shape: f32[1,32], index: 3, kind: input, shape index: {}]   ;;  %s1236_s4 = inlined_call_operand.vmem [shape: f32[1,32], index: 4, kind: input, shape index: {}]   ;;  %s1237_s5 = inlined_call_operand.hbm [shape: f32[32,128], index: 5, kind: input, shape index: {}]   ;;  %s1238_s6 = inlined_call_operand.vmem [shape: f32[1,128], index: 6, kind: input, shape index: {}]   ;;  %s1239_s7 = inlined_call_operand.hbm [shape: f32[16,128], index: 7, kind: output, shape index: {}]  }
   0x1   :  { %14 = vsyncpa [#allocation3 + $0x1], 0 }
   0x2   :  { %15 = vsyncpa [#allocation6], 0 }
   0x3   :  { %16 = vsyncpa [#allocation4], 0 }
   0x4   :  { %18 = vsyncpa [#allocation4 + $0x1], 0  ;;  %s983_s24 = smov 0   ;;  %s985_s25 = smov 0  }
   0x5   :  { %s987_s26 = smov 0   ;;  %s989_s27 = smov 0  }
   0x6 LB: > { %s1004_s28 = sadd.s32 4294967295, %s932_s27   ;;  %s634_s29 = sadd.s32 4294967294, %s932_s27   ;;  %s932_s27 = sphi %s989_s27, %s1259_s27   ;;  %s928_s26 = sphi %s987_s26, %s1258_s26   ;;  %s924_s25 = sphi %s985_s25, %s1257_s25   ;;  %s920_s24 = sphi %s983_s24, %s1256_s24  }
   0x7   : > { %p44_p0 = scmp.ne.s32.totalorder %s924_s25, %s920_s24  ;;  %p1240_p1 = scmp.eq.s32.totalorder %s1004_s28, 0 }
   0x8   : > { %p200_p3 = scmp.eq.s32.totalorder %s634_s29, 1  ;;  %p635_p5 = scmp.ge.s32.totalorder %s932_s27, 1 }
   0x9   : > { %p1013_p4 = por %p1240_p1, %p44_p0  ;;  %p207_p7 = scmp.lt.s32.totalorder %s932_s27, 3 }
   0xa   : > { %p1018_p6 = por %p200_p3, %p44_p0  ;;  %s934_s10 = smov [#allocation5]  }
   0xb   : > { %s1243_s30 = scalar_select %p1013_p4, 1, 0 }
   0xc   : > { %s1244_s8 = scalar_select %p1018_p6, 1, 0 }
   0xd   : > { %p1023_p8 = pnand %p635_p5, %p207_p7  ;;  %s219_s11 = sshll.u32 %s934_s10, 4  ;;  %s1027_s11 = int_to_ptr.vmem [resolvable:$true] %s219_s11 }
   0xe   : > { %s935_s13 = smov [#allocation7]   ;;  %s776_s17 = scalar_lea.hbm %s1233_s1, 512 }
   0xf   : > { %p712_p9 = pneg %p1023_p8  ;;  %s241_s14 = sshll.u32 %s935_s13, 4  ;;  %s1038_s14 = int_to_ptr.vmem [resolvable:$true] %s241_s14 }
  0x10   : > { %p777_p12 = scmp.ne.s32.totalorder %s1233_s1, %s776_s17  ;;  %p783_p5 = scmp.lt.u32.totalorder %s776_s17, %s1233_s1 }
  0x11   : > { %p1034_p11 = pnand %p712_p9, %p1240_p1 }
  0x13   : > { %p778_p13 = pneg %p1034_p11 }
  0x15   : > { %p779_p0 = pnand %p778_p13, %p777_p12 }
  0x17   : > { %p780_p3 = pneg %p779_p0 }
  0x19   : > { %p785_p7 = pnand %p783_p5, %p780_p3 }
  0x1b   : > { %788 = shalt.err (!%p785_p7)
}
  0x1c   : > { %s789_s22 = scalar_lea.vmem %s1027_s11, 512  ;;  %p797_p2 = scmp.lt.s32.totalorder %s1027_s11, %s1027_s11 }
  0x1d   : > { %p790_p9 = scmp.ne.s32.totalorder %s1027_s11, %s789_s22  ;;  %p798_p12 = scmp.lt.s32.totalorder %s789_s22, %s789_s22 }
  0x1f   : > { %p792_p10 = pnand %p790_p9, %p778_p13  ;;  %p799_p0 = por %p798_p12, %p797_p2 }
  0x21   : > { %p793_p1 = pneg %p792_p10 }
  0x23   : > { %p800_p6 = pnand %p799_p0, %p793_p1 }
  0x25   : > { %803 = shalt.err (!%p800_p6)
}
  0x26   : > { %s936_s23 = smov 128   ;;  %s937_s29 = smov 8  }
  0x27   : > { %715 = dma.hbm_to_vmem [thread:$0]  (!%p1034_p11), %s1233_s1, 512, %s1027_s11, [#allocation6], %s936_s23, %s936_s23, %s937_s29  }
  0x28   : > { %s804_s17 = scalar_lea.hbm %s1237_s5, 512 }
  0x29   : > { %p805_p2 = scmp.ne.s32.totalorder %s1237_s5, %s804_s17  ;;  %p811_p10 = scmp.lt.u32.totalorder %s804_s17, %s1237_s5 }
  0x2b   : > { %p807_p1 = pnand %p805_p2, %p778_p13 }
  0x2d   : > { %p808_p6 = pneg %p807_p1 }
  0x2f   : > { %p813_p3 = pnand %p811_p10, %p808_p6 }
  0x31   : > { %816 = shalt.err (!%p813_p3)
}
  0x32   : > { %s817_s11 = scalar_lea.vmem %s1038_s14, 512  ;;  %p825_p12 = scmp.lt.s32.totalorder %s1038_s14, %s1038_s14 }
  0x33   : > { %p818_p5 = scmp.ne.s32.totalorder %s1038_s14, %s817_s11  ;;  %p826_p0 = scmp.lt.s32.totalorder %s817_s11, %s817_s11 }
  0x35   : > { %p820_p7 = pnand %p818_p5, %p778_p13  ;;  %p827_p2 = por %p826_p0, %p825_p12 }
  0x37   : > { %p821_p9 = pneg %p820_p7 }
  0x39   : > { %p828_p1 = pnand %p827_p2, %p821_p9 }
  0x3b   : > { %831 = shalt.err (!%p828_p1)
}
  0x3c   : > { %718 = dma.hbm_to_vmem [thread:$0]  (!%p1034_p11), %s1237_s5, 512, %s1038_s14, [#allocation6], %s936_s23, %s936_s23, %s937_s29  }
  0x3d   : > { %s1093_s13 = sadd.s32 1, %s932_s27   ;;  %s31_s12 = sadd.s32 1, %s928_s26 }
  0x3e   : > { %s28_s15 = ssub.s32 %s932_s27, %s1093_s13  ;;  %p38_p13 = scmp.ne.s32.totalorder %s928_s26, %s924_s25 }
  0x3f   : > { %p29_p6 = scmp.eq.s32.totalorder %s28_s15, 0  ;;  %p39_p10 = scmp.eq.s32.totalorder %s932_s27, 0 }
  0x40   : > { %p1247_p3 = scmp.eq.s32.totalorder %s1004_s28, 1  ;;  %p729_p7 = scmp.lt.s32.totalorder %s932_s27, 2 }
  0x41   : > { %s1109_s17 = scalar_select %p29_p6, %s928_s26, %s31_s12  }
  0x42   : > { %p1103_p5 = por %p1247_p3, %p38_p13  ;;  %p40_p9 = por %p39_p10, %p38_p13 }
  0x43   : > { %s258_s18 = sand.u32 1, %s928_s26   ;;  %s640_s14 = sshll.u32 %s932_s27, 7 }
  0x44   : > { %s1248_s16 = scalar_select %p1103_p5, 1, 0 }
  0x45   : > { %s639_s19 = sshll.u32 %s258_s18, 3  ;;  %s1116_s20 = scalar_lea.hbm %s1232_s0, %s640_s14 }
  0x46   : > { %s262_s21 = scalar_lea.vmem [#allocation2], %s639_s19  ;;  %p1120_p11 = pnand %p729_p7, %p40_p9 }
  0x47   : > { %s269_s11 = sshll.u32 %s262_s21, 4  ;;  %s259_s10 = scalar_lea.sflag [#allocation3], %s258_s18  ;;  %s1118_s11 = int_to_ptr.vmem [resolvable:$true] %s269_s11 }
  0x48   : > { %s832_s12 = scalar_lea.hbm %s1116_s20, 128  ;;  %p834_p0 = pneg %p1120_p11 }
  0x49   : > { %p833_p12 = scmp.ne.s32.totalorder %s1116_s20, %s832_s12  ;;  %s837_s14 = scalar_lea.hbm %s1232_s0, 256 }
  0x4a   : > { %p838_p13 = scmp.lt.u32.totalorder %s1116_s20, %s1232_s0  ;;  %p839_p6 = scmp.lt.u32.totalorder %s837_s14, %s832_s12 }
  0x4b   : > { %p835_p2 = pnand %p834_p0, %p833_p12  ;;  %p841_p3 = scmp.lt.u32.totalorder %s832_s12, %s1116_s20 }
  0x4c   : > { %p840_p10 = por %p839_p6, %p838_p13 }
  0x4d   : > { %p836_p1 = pneg %p835_p2 }
  0x4e   : > { %p842_p7 = por %p841_p3, %p840_p10 }
  0x50   : > { %p843_p9 = pnand %p842_p7, %p836_p1 }
  0x52   : > { %846 = shalt.err (!%p843_p9)
}
  0x53   : > { %s847_s18 = scalar_lea.vmem %s1118_s11, 128  ;;  %s938_s21 = smov [#allocation2]  }
  0x54   : > { %p848_p12 = scmp.ne.s32.totalorder %s1118_s11, %s847_s18  ;;  %s852_s15 = sshll.u32 %s938_s21, 4  ;;  %s853_s15 = int_to_ptr.vmem [resolvable:$false] %s852_s15 }
  0x55   : > { %s854_s19 = scalar_lea.vmem %s853_s15, 256  ;;  %p855_p4 = scmp.lt.s32.totalorder %s1118_s11, %s853_s15 }
  0x56   : > { %p850_p2 = pnand %p848_p12, %p834_p0  ;;  %p856_p13 = scmp.lt.s32.totalorder %s854_s19, %s847_s18 }
  0x58   : > { %p851_p5 = pneg %p850_p2  ;;  %p857_p6 = por %p856_p13, %p855_p4 }
  0x5a   : > { %p858_p10 = pnand %p857_p6, %p851_p5 }
  0x5c   : > { %861 = shalt.err (!%p858_p10)
}
  0x5d   : > { %722 = dma.hbm_to_vmem [thread:$0]  (!%p1120_p11), %s1116_s20, 128, %s1118_s11, %s259_s10  }
  0x5e   : > { %278 = sbr.rel (%p1023_p8) target bundleno = 895 (0x37f), region = 48  ;;  %s1152_s12 = sand.u32 (!%p1023_p8), 1, %s924_s25  }
  0x5f   : > { %s642_s14 = sshll.u32 (!%p1023_p8), %s1152_s12, 3  ;;  %s281_s23 = scalar_lea.sflag (!%p1023_p8), [#allocation3], %s1152_s12 }
  0x60   : > { %s284_s29 = scalar_lea.vmem (!%p1023_p8), [#allocation2], %s642_s14  ;;  %p1250_p4 = scmp.ne.s32.totalorder (!%p1023_p8), %s1243_s30, 0 }
  0x65   : > { %907 = dma.done.wait (%p1250_p4), %s281_s23, 128  }
  0x66   : > { %909 = vsyncadd (%p1250_p4), %s281_s23, 4294967168  ;;  %p1251_p5 = scmp.eq.s32.totalorder %s1004_s28, 0 }
  0x68   : > { %911 = dma.done.wait (%p1251_p5), [#allocation6], 1024   ;;  %p1252_p8 = pmov %p1251_p5 }
  0x69   : > { %v939_v0 = vmov 0.0|0.0   ;;  %vm940_vm0 = vmmov 0   ;;  %v941_v1 = vmov 0.0   ;;  %v324_v2 = vld [vmem:[#allocation5] sm:$0xff]  ;;  %v325_v3 = vld [vmem:[#allocation5 + $0x8] sm:$0xff]  ;;  %v326_v4 = vld [vmem:[#allocation5 + $0x10] sm:$0xff] }
  0x6a   : > { %913 = vsyncadd (%p1252_p8), [#allocation6], 4294966272  ;;  %688 = vmatprep.subr.bf16.mxu0 %v939_v0  ;;  %674 = vmatprep.mubr.msk.f32.mxu0 %vm940_vm0, %v941_v1  ;;  %v689_v5 = vpack.c.bf16 %v325_v3, %v324_v2  ;;  %v327_v6 = vld [vmem:[#allocation5 + $0x18] sm:$0xff]  ;;  %vm335_vm1 = vcmask 261120   ;;  %v646_v9 = vld [vmem:[%s1234_s2] ss:$0 sm:$0xff] }
  0x6b   : > { %694 = vmatprep.subr.bf16.mxu1 %v939_v0  ;;  %685 = vmatprep.mubr.msk.f32.mxu1 %vm940_vm0, %v941_v1  ;;  %v692_v7 = vpack.c.bf16 %v327_v6, %v326_v4  ;;  %v323_v8 = vld [vmem:[%s284_s29] sm:$0xff]  ;;  %v446_v27 = vld [vmem:[#allocation7] sm:$0xff]  ;;  %v447_v28 = vld [vmem:[#allocation7 + $0x8] sm:$0xff]  ;;  %s653_s15 = sshll.u32 %s1004_s28, 7  ;;  %s322_s19 = scalar_lea.vmem [#allocation8], %s642_s14 }
  0x6c   : > { %690 = vmatpush3.bf16.msra.mxu0 %v689_v5  ;;  %v448_v29 = vld [vmem:[#allocation7 + $0x10] sm:$0xff]  ;;  %v695_v30 = vpack.c.bf16 %v447_v28, %v446_v27  ;;  %v449_v31 = vld [vmem:[#allocation7 + $0x18] sm:$0xff]  ;;  %s545_s23 = sshll.u32 %s322_s19, 4  ;;  %s1188_s9 = scalar_lea.hbm %s1239_s7, %s653_s15  ;;  %s1190_s23 = int_to_ptr.vmem [resolvable:$true] %s545_s23 }
  0x6d   : > { %691 = vmatprep.subr.bf16.mxu0 %v939_v0  ;;  %v698_v32 = vpack.c.bf16 %v449_v31, %v448_v29  ;;  %v648_v37 = vld [vmem:[%s1235_s3] ss:$0 sm:$0xff]  ;;  %s532_s20 = scalar_lea.sflag [#allocation4], %s1152_s12  ;;  %s862_s11 = scalar_lea.vmem %s1190_s23, 128 }
  0x6e   : > { %696 = vmatpush3.bf16.msra.mxu1 %v695_v30  ;;  %v649_v39 = vld [vmem:[%s1236_s4] ss:$0 sm:$0xff]  ;;  %p863_p11 = scmp.ne.s32.totalorder %s1190_s23, %s862_s11  ;;  %p1253_p0 = scmp.ne.s32.totalorder %s1248_s16, 0 }
  0x6f   : > { %697 = vmatprep.subr.bf16.mxu1 %v939_v0  ;;  %v650_v42 = vld [vmem:[%s1238_s6] ss:$0 sm:$0xff]  ;;  %s942_s28 = smov [#allocation8]  }
  0x70   : > { %693 = vmatpush3.bf16.msra.mxu0 %v692_v7  ;;  %p864_p1 = pnand %p863_p11, %p1253_p0  ;;  %s866_s14 = sshll.u32 %s942_s28, 4  ;;  %s867_s14 = int_to_ptr.vmem [resolvable:$false] %s866_s14 }
  0x71   : > { %s868_s22 = scalar_lea.vmem %s867_s14, 256  ;;  %p869_p7 = scmp.lt.s32.totalorder %s1190_s23, %s867_s14 }
  0x72   : > { %699 = vmatpush3.bf16.msra.mxu1 %v698_v32  ;;  %p865_p3 = pneg %p864_p1  ;;  %p870_p9 = scmp.lt.s32.totalorder %s868_s22, %s862_s11 }
  0x73   : > { %675 = vmatmul.mubr.msk.f32.vlgmr.msra.gmra.mrb[0].mxu0 %vm335_vm1, %v323_v8 }
  0x74   : > { %p871_p12 = por %p870_p9, %p869_p7 }
  0x76   : > { %p872_p2 = pnand %p871_p12, %p865_p3 }
 0x146   : > { %v405_v10 = vpop.f32.mrb[0].mxu0 }
 0x147   : > { %v406_v11 = vadd.f32 %v646_v9, %v405_v10  ;;  %v676_v12 = vpop.f32.mrb[1].mxu0 }
 0x149   : > { %v409_v13 = vmul.f32 %v406_v11, %v406_v11 }
 0x14b   : > { %v410_v14 = vmul.f32 0.035677407, %v409_v13 }
 0x14d   : > { %v411_v15 = vadd.f32 0.7978846, %v410_v14 }
 0x14f   : > { %v412_v16 = vmul.f32 %v411_v15, %v406_v11 }
 0x151   : > { %772 = vtanh.f32 %v412_v16 }
 0x15b   : > { %v773_v17 = vpop.eup %772 }
 0x15c   : > { %v414_v18 = vmul.f32 0.5, %v773_v17 }
 0x15e   : > { %v415_v19 = vadd.f32 0.5, %v414_v18 }
 0x160   : > { %v416_v20 = vmul.f32 %v415_v19, %v406_v11 }
 0x162   : > { %v417_v21 = vsel %vm335_vm1, %v416_v20, 0.0 }
 0x163   : > { %418 = vadd.xlane.f32.xlu0 %v417_v21 }
 0x1f0   : > { %v419_v22 = vpop.xlane.xlu0 %418 }
 0x1f1   : > { %v420_v23 = vmul.f32 0.03125, %v419_v22 }
 0x1f3   : > { %v421_v24 = vsub.f32 %v416_v20, %v420_v23 }
 0x1f5   : > { %v422_v25 = vmul.f32 %v421_v24, %v421_v24 }
 0x1f7   : > { %v423_v26 = vsel %vm335_vm1, %v422_v25, 0.0 }
 0x1f8   : > { %424 = vadd.xlane.f32.xlu0 %v423_v26 }
 0x285   : > { %v425_v33 = vpop.xlane.xlu0 %424 }
 0x286   : > { %v426_v34 = vmul.f32 0.03125, %v425_v33 }
 0x288   : > { %v427_v35 = vadd.f32 1e-12, %v426_v34 }
 0x28a   : > { %774 = vrsqrt.f32 %v427_v35 }
 0x294   : > { %v775_v36 = vpop.eup %774 }
 0x295   : > { %v429_v38 = vmul.f32 %v775_v36, %v421_v24 }
 0x297   : > { %v437_v40 = vmul.f32 %v648_v37, %v429_v38 }
 0x299   : > { %v445_v41 = vadd.f32 %v649_v39, %v437_v40 }
 0x29b   : > { %686 = vmatmul.mubr.msk.f32.vlgmr.msra.gmra.mrb[0].mxu1 %vm335_vm1, %v445_v41 }
 0x36e   : > { %v526_v43 = vpop.f32.mrb[0].mxu1 }
 0x36f   : > { %v527_v44 = vadd.f32 %v650_v42, %v526_v43  ;;  %v687_v45 = vpop.f32.mrb[1].mxu1 }
 0x371   : > { %530 = vst [vmem:[%s322_s19] sm:$0xff] %v527_v44 }
 0x372   : > { %875 = shalt.err (!%p872_p2)
}
 0x373   : > { %s876_s12 = scalar_lea.hbm %s1188_s9, 128  ;;  %s880_s21 = scalar_lea.hbm %s1239_s7, 256 }
 0x374   : > { %p877_p13 = scmp.ne.s32.totalorder %s1188_s9, %s876_s12  ;;  %p881_p4 = scmp.lt.u32.totalorder %s1188_s9, %s1239_s7 }
 0x375   : > { %p882_p5 = scmp.lt.u32.totalorder %s880_s21, %s876_s12  ;;  %p884_p11 = scmp.lt.u32.totalorder %s876_s12, %s1188_s9 }
 0x376   : > { %p878_p6 = pnand %p877_p13, %p1253_p0 }
 0x377   : > { %p883_p8 = por %p882_p5, %p881_p4 }
 0x378   : > { %p879_p10 = pneg %p878_p6 }
 0x379   : > { %p885_p1 = por %p884_p11, %p883_p8 }
 0x37b   : > { %p886_p3 = pnand %p885_p1, %p879_p10 }
 0x37d   : > { %889 = shalt.err (!%p886_p3)
}
 0x37e   : > { %710 = dma.vmem_to_hbm [thread:$0]  (%p1253_p0), %s1190_s23, 128, %s1188_s9, %s532_s20  }
 0x37f PF: > { %s557_s29 = sand.u32 1, %s920_s24   ;;  %p1254_p7 = scmp.ne.s32.totalorder %s1244_s8, 0 }
 0x380   : > { %p1255_p9 = scmp.ge.s32.totalorder %s932_s27, 2  ;;  %s558_s30 = scalar_lea.sflag [#allocation4], %s557_s29 }
 0x382   : > { %p724_p12 = pnand %p1255_p9, %p1254_p7 }
 0x384   : > { %915 = dma.done.wait (!%p724_p12), %s558_s30, 128  }
 0x385   : > { %917 = vsyncadd (!%p724_p12), %s558_s30, 4294967168  ;;  %p21_p2 = scmp.ge.s32.totalorder %s1093_s13, 4   ;;  %s1256_s24 = smov %s924_s25 }
 0x386   : > { %s1257_s25 = smov %s928_s26  ;;  %s1258_s26 = smov %s1109_s17 }
 0x387   : > { %s1259_s27 = smov %s1093_s13  ;;  %23 = sbr.rel (!%p21_p2) target bundleno = 6 (0x6), region = 101 }
 0x38e   :  { %563 = vsyncpa [#allocation3], 1 }
 0x38f   :  { %565 = vsyncpa [#allocation3 + $0x1], 1 }
 0x390   :  { %566 = vsyncpa [#allocation6], 1 }
 0x391   :  { %567 = vsyncpa [#allocation4], 1 }
 0x392   :  { %569 = vsyncpa [#allocation4 + $0x1], 1 }

// kernel: tpu_custom_call.1
= control target key start
LH: loop header
LB: loop body
LE: loop exit
PB: predicated region body
PF: predicated region fallthrough
CT: control target
= control target key end

     0   :  { %12 = vsyncpa [#allocation3], 0  ;;  %s1232_s0 = inlined_call_operand.hbm [shape: f32[16,32], index: 0, kind: input, shape index: {}]   ;;  %s1233_s1 = inlined_call_operand.hbm [shape: f32[32,32], index: 1, kind: input, shape index: {}]   ;;  %s1234_s2 = inlined_call_operand.vmem [shape: f32[1,32], index: 2, kind: input, shape index: {}]   ;;  %s1235_s3 = inlined_call_operand.vmem [shape: f32[1,32], index: 3, kind: input, shape index: {}]   ;;  %s1236_s4 = inlined_call_operand.vmem [shape: f32[1,32], index: 4, kind: input, shape index: {}]   ;;  %s1237_s5 = inlined_call_operand.hbm [shape: f32[32,128], index: 5, kind: input, shape index: {}]   ;;  %s1238_s6 = inlined_call_operand.vmem [shape: f32[1,128], index: 6, kind: input, shape index: {}]   ;;  %s1239_s7 = inlined_call_operand.hbm [shape: f32[16,128], index: 7, kind: output, shape index: {}]  }
   0x1   :  { %14 = vsyncpa [#allocation3 + $0x1], 0 }
   0x2   :  { %15 = vsyncpa [#allocation6], 0 }
   0x3   :  { %16 = vsyncpa [#allocation4], 0 }
   0x4   :  { %18 = vsyncpa [#allocation4 + $0x1], 0  ;;  %s983_s24 = smov 0   ;;  %s985_s25 = smov 0  }
   0x5   :  { %s987_s26 = smov 0   ;;  %s989_s27 = smov 0  }
   0x6 LB: > { %s1004_s28 = sadd.s32 4294967295, %s932_s27   ;;  %s634_s29 = sadd.s32 4294967294, %s932_s27   ;;  %s932_s27 = sphi %s989_s27, %s1259_s27   ;;  %s928_s26 = sphi %s987_s26, %s1258_s26   ;;  %s924_s25 = sphi %s985_s25, %s1257_s25   ;;  %s920_s24 = sphi %s983_s24, %s1256_s24  }
   0x7   : > { %p44_p0 = scmp.ne.s32.totalorder %s924_s25, %s920_s24  ;;  %p1240_p1 = scmp.eq.s32.totalorder %s1004_s28, 0 }
   0x8   : > { %p200_p3 = scmp.eq.s32.totalorder %s634_s29, 1  ;;  %p635_p5 = scmp.ge.s32.totalorder %s932_s27, 1 }
   0x9   : > { %p1013_p4 = por %p1240_p1, %p44_p0  ;;  %p207_p7 = scmp.lt.s32.totalorder %s932_s27, 3 }
   0xa   : > { %p1018_p6 = por %p200_p3, %p44_p0  ;;  %s934_s10 = smov [#allocation5]  }
   0xb   : > { %s1243_s30 = scalar_select %p1013_p4, 1, 0 }
   0xc   : > { %s1244_s8 = scalar_select %p1018_p6, 1, 0 }
   0xd   : > { %p1023_p8 = pnand %p635_p5, %p207_p7  ;;  %s219_s11 = sshll.u32 %s934_s10, 4  ;;  %s1027_s11 = int_to_ptr.vmem [resolvable:$true] %s219_s11 }
   0xe   : > { %s935_s13 = smov [#allocation7]   ;;  %s776_s17 = scalar_lea.hbm %s1233_s1, 512 }
   0xf   : > { %p712_p9 = pneg %p1023_p8  ;;  %s241_s14 = sshll.u32 %s935_s13, 4  ;;  %s1038_s14 = int_to_ptr.vmem [resolvable:$true] %s241_s14 }
  0x10   : > { %p777_p12 = scmp.ne.s32.totalorder %s1233_s1, %s776_s17  ;;  %p783_p5 = scmp.lt.u32.totalorder %s776_s17, %s1233_s1 }
  0x11   : > { %p1034_p11 = pnand %p712_p9, %p1240_p1 }
  0x13   : > { %p778_p13 = pneg %p1034_p11 }
  0x15   : > { %p779_p0 = pnand %p778_p13, %p777_p12 }
  0x17   : > { %p780_p3 = pneg %p779_p0 }
  0x19   : > { %p785_p7 = pnand %p783_p5, %p780_p3 }
  0x1b   : > { %788 = shalt.err (!%p785_p7)
}
  0x1c   : > { %s789_s22 = scalar_lea.vmem %s1027_s11, 512  ;;  %p797_p2 = scmp.lt.s32.totalorder %s1027_s11, %s1027_s11 }
  0x1d   : > { %p790_p9 = scmp.ne.s32.totalorder %s1027_s11, %s789_s22  ;;  %p798_p12 = scmp.lt.s32.totalorder %s789_s22, %s789_s22 }
  0x1f   : > { %p792_p10 = pnand %p790_p9, %p778_p13  ;;  %p799_p0 = por %p798_p12, %p797_p2 }
  0x21   : > { %p793_p1 = pneg %p792_p10 }
  0x23   : > { %p800_p6 = pnand %p799_p0, %p793_p1 }
  0x25   : > { %803 = shalt.err (!%p800_p6)
}
  0x26   : > { %s936_s23 = smov 128   ;;  %s937_s29 = smov 8  }
  0x27   : > { %715 = dma.hbm_to_vmem [thread:$0]  (!%p1034_p11), %s1233_s1, 512, %s1027_s11, [#allocation6], %s936_s23, %s936_s23, %s937_s29  }
  0x28   : > { %s804_s17 = scalar_lea.hbm %s1237_s5, 512 }
  0x29   : > { %p805_p2 = scmp.ne.s32.totalorder %s1237_s5, %s804_s17  ;;  %p811_p10 = scmp.lt.u32.totalorder %s804_s17, %s1237_s5 }
  0x2b   : > { %p807_p1 = pnand %p805_p2, %p778_p13 }
  0x2d   : > { %p808_p6 = pneg %p807_p1 }
  0x2f   : > { %p813_p3 = pnand %p811_p10, %p808_p6 }
  0x31   : > { %816 = shalt.err (!%p813_p3)
}
  0x32   : > { %s817_s11 = scalar_lea.vmem %s1038_s14, 512  ;;  %p825_p12 = scmp.lt.s32.totalorder %s1038_s14, %s1038_s14 }
  0x33   : > { %p818_p5 = scmp.ne.s32.totalorder %s1038_s14, %s817_s11  ;;  %p826_p0 = scmp.lt.s32.totalorder %s817_s11, %s817_s11 }
  0x35   : > { %p820_p7 = pnand %p818_p5, %p778_p13  ;;  %p827_p2 = por %p826_p0, %p825_p12 }
  0x37   : > { %p821_p9 = pneg %p820_p7 }
  0x39   : > { %p828_p1 = pnand %p827_p2, %p821_p9 }
  0x3b   : > { %831 = shalt.err (!%p828_p1)
}
  0x3c   : > { %718 = dma.hbm_to_vmem [thread:$0]  (!%p1034_p11), %s1237_s5, 512, %s1038_s14, [#allocation6], %s936_s23, %s936_s23, %s937_s29  }
  0x3d   : > { %s1093_s13 = sadd.s32 1, %s932_s27   ;;  %s31_s12 = sadd.s32 1, %s928_s26 }
  0x3e   : > { %s28_s15 = ssub.s32 %s932_s27, %s1093_s13  ;;  %p38_p13 = scmp.ne.s32.totalorder %s928_s26, %s924_s25 }
  0x3f   : > { %p29_p6 = scmp.eq.s32.totalorder %s28_s15, 0  ;;  %p39_p10 = scmp.eq.s32.totalorder %s932_s27, 0 }
  0x40   : > { %p1247_p3 = scmp.eq.s32.totalorder %s1004_s28, 1  ;;  %p729_p7 = scmp.lt.s32.totalorder %s932_s27, 2 }
  0x41   : > { %s1109_s17 = scalar_select %p29_p6, %s928_s26, %s31_s12  }
  0x42   : > { %p1103_p5 = por %p1247_p3, %p38_p13  ;;  %p40_p9 = por %p39_p10, %p38_p13 }
  0x43   : > { %s258_s18 = sand.u32 1, %s928_s26   ;;  %s640_s14 = sshll.u32 %s932_s27, 7 }
  0x44   : > { %s1248_s16 = scalar_select %p1103_p5, 1, 0 }
  0x45   : > { %s639_s19 = sshll.u32 %s258_s18, 3  ;;  %s1116_s20 = scalar_lea.hbm %s1232_s0, %s640_s14 }
  0x46   : > { %s262_s21 = scalar_lea.vmem [#allocation2], %s639_s19  ;;  %p1120_p11 = pnand %p729_p7, %p40_p9 }
  0x47   : > { %s269_s11 = sshll.u32 %s262_s21, 4  ;;  %s259_s10 = scalar_lea.sflag [#allocation3], %s258_s18  ;;  %s1118_s11 = int_to_ptr.vmem [resolvable:$true] %s269_s11 }
  0x48   : > { %s832_s12 = scalar_lea.hbm %s1116_s20, 128  ;;  %p834_p0 = pneg %p1120_p11 }
  0x49   : > { %p833_p12 = scmp.ne.s32.totalorder %s1116_s20, %s832_s12  ;;  %s837_s14 = scalar_lea.hbm %s1232_s0, 256 }
  0x4a   : > { %p838_p13 = scmp.lt.u32.totalorder %s1116_s20, %s1232_s0  ;;  %p839_p6 = scmp.lt.u32.totalorder %s837_s14, %s832_s12 }
  0x4b   : > { %p835_p2 = pnand %p834_p0, %p833_p12  ;;  %p841_p3 = scmp.lt.u32.totalorder %s832_s12, %s1116_s20 }
  0x4c   : > { %p840_p10 = por %p839_p6, %p838_p13 }
  0x4d   : > { %p836_p1 = pneg %p835_p2 }
  0x4e   : > { %p842_p7 = por %p841_p3, %p840_p10 }
  0x50   : > { %p843_p9 = pnand %p842_p7, %p836_p1 }
  0x52   : > { %846 = shalt.err (!%p843_p9)
}
  0x53   : > { %s847_s18 = scalar_lea.vmem %s1118_s11, 128  ;;  %s938_s21 = smov [#allocation2]  }
  0x54   : > { %p848_p12 = scmp.ne.s32.totalorder %s1118_s11, %s847_s18  ;;  %s852_s15 = sshll.u32 %s938_s21, 4  ;;  %s853_s15 = int_to_ptr.vmem [resolvable:$false] %s852_s15 }
  0x55   : > { %s854_s19 = scalar_lea.vmem %s853_s15, 256  ;;  %p855_p4 = scmp.lt.s32.totalorder %s1118_s11, %s853_s15 }
  0x56   : > { %p850_p2 = pnand %p848_p12, %p834_p0  ;;  %p856_p13 = scmp.lt.s32.totalorder %s854_s19, %s847_s18 }
  0x58   : > { %p851_p5 = pneg %p850_p2  ;;  %p857_p6 = por %p856_p13, %p855_p4 }
  0x5a   : > { %p858_p10 = pnand %p857_p6, %p851_p5 }
  0x5c   : > { %861 = shalt.err (!%p858_p10)
}
  0x5d   : > { %722 = dma.hbm_to_vmem [thread:$0]  (!%p1120_p11), %s1116_s20, 128, %s1118_s11, %s259_s10  }
  0x5e   : > { %278 = sbr.rel (%p1023_p8) target bundleno = 895 (0x37f), region = 48  ;;  %s1152_s12 = sand.u32 (!%p1023_p8), 1, %s924_s25  }
  0x5f   : > { %s642_s14 = sshll.u32 (!%p1023_p8), %s1152_s12, 3  ;;  %s281_s23 = scalar_lea.sflag (!%p1023_p8), [#allocation3], %s1152_s12 }
  0x60   : > { %s284_s29 = scalar_lea.vmem (!%p1023_p8), [#allocation2], %s642_s14  ;;  %p1250_p4 = scmp.ne.s32.totalorder (!%p1023_p8), %s1243_s30, 0 }
  0x65   : > { %907 = dma.done.wait (%p1250_p4), %s281_s23, 128  }
  0x66   : > { %909 = vsyncadd (%p1250_p4), %s281_s23, 4294967168  ;;  %p1251_p5 = scmp.eq.s32.totalorder %s1004_s28, 0 }
  0x68   : > { %911 = dma.done.wait (%p1251_p5), [#allocation6], 1024   ;;  %p1252_p8 = pmov %p1251_p5 }
  0x69   : > { %v939_v0 = vmov 0.0|0.0   ;;  %vm940_vm0 = vmmov 0   ;;  %v941_v1 = vmov 0.0   ;;  %v324_v2 = vld [vmem:[#allocation5] sm:$0xff]  ;;  %v325_v3 = vld [vmem:[#allocation5 + $0x8] sm:$0xff]  ;;  %v326_v4 = vld [vmem:[#allocation5 + $0x10] sm:$0xff] }
  0x6a   : > { %913 = vsyncadd (%p1252_p8), [#allocation6], 4294966272  ;;  %688 = vmatprep.subr.bf16.mxu0 %v939_v0  ;;  %674 = vmatprep.mubr.msk.f32.mxu0 %vm940_vm0, %v941_v1  ;;  %v689_v5 = vpack.c.bf16 %v325_v3, %v324_v2  ;;  %v327_v6 = vld [vmem:[#allocation5 + $0x18] sm:$0xff]  ;;  %vm335_vm1 = vcmask 261120   ;;  %v646_v9 = vld [vmem:[%s1234_s2] ss:$0 sm:$0xff] }
  0x6b   : > { %694 = vmatprep.subr.bf16.mxu1 %v939_v0  ;;  %685 = vmatprep.mubr.msk.f32.mxu1 %vm940_vm0, %v941_v1  ;;  %v692_v7 = vpack.c.bf16 %v327_v6, %v326_v4  ;;  %v323_v8 = vld [vmem:[%s284_s29] sm:$0xff]  ;;  %v446_v27 = vld [vmem:[#allocation7] sm:$0xff]  ;;  %v447_v28 = vld [vmem:[#allocation7 + $0x8] sm:$0xff]  ;;  %s653_s15 = sshll.u32 %s1004_s28, 7  ;;  %s322_s19 = scalar_lea.vmem [#allocation8], %s642_s14 }
  0x6c   : > { %690 = vmatpush3.bf16.msra.mxu0 %v689_v5  ;;  %v448_v29 = vld [vmem:[#allocation7 + $0x10] sm:$0xff]  ;;  %v695_v30 = vpack.c.bf16 %v447_v28, %v446_v27  ;;  %v449_v31 = vld [vmem:[#allocation7 + $0x18] sm:$0xff]  ;;  %s545_s23 = sshll.u32 %s322_s19, 4  ;;  %s1188_s9 = scalar_lea.hbm %s1239_s7, %s653_s15  ;;  %s1190_s23 = int_to_ptr.vmem [resolvable:$true] %s545_s23 }
  0x6d   : > { %691 = vmatprep.subr.bf16.mxu0 %v939_v0  ;;  %v698_v32 = vpack.c.bf16 %v449_v31, %v448_v29  ;;  %v648_v37 = vld [vmem:[%s1235_s3] ss:$0 sm:$0xff]  ;;  %s532_s20 = scalar_lea.sflag [#allocation4], %s1152_s12  ;;  %s862_s11 = scalar_lea.vmem %s1190_s23, 128 }
  0x6e   : > { %696 = vmatpush3.bf16.msra.mxu1 %v695_v30  ;;  %v649_v39 = vld [vmem:[%s1236_s4] ss:$0 sm:$0xff]  ;;  %p863_p11 = scmp.ne.s32.totalorder %s1190_s23, %s862_s11  ;;  %p1253_p0 = scmp.ne.s32.totalorder %s1248_s16, 0 }
  0x6f   : > { %697 = vmatprep.subr.bf16.mxu1 %v939_v0  ;;  %v650_v42 = vld [vmem:[%s1238_s6] ss:$0 sm:$0xff]  ;;  %s942_s28 = smov [#allocation8]  }
  0x70   : > { %693 = vmatpush3.bf16.msra.mxu0 %v692_v7  ;;  %p864_p1 = pnand %p863_p11, %p1253_p0  ;;  %s866_s14 = sshll.u32 %s942_s28, 4  ;;  %s867_s14 = int_to_ptr.vmem [resolvable:$false] %s866_s14 }
  0x71   : > { %s868_s22 = scalar_lea.vmem %s867_s14, 256  ;;  %p869_p7 = scmp.lt.s32.totalorder %s1190_s23, %s867_s14 }
  0x72   : > { %699 = vmatpush3.bf16.msra.mxu1 %v698_v32  ;;  %p865_p3 = pneg %p864_p1  ;;  %p870_p9 = scmp.lt.s32.totalorder %s868_s22, %s862_s11 }
  0x73   : > { %675 = vmatmul.mubr.msk.f32.vlgmr.msra.gmra.mrb[0].mxu0 %vm335_vm1, %v323_v8 }
  0x74   : > { %p871_p12 = por %p870_p9, %p869_p7 }
  0x76   : > { %p872_p2 = pnand %p871_p12, %p865_p3 }
 0x146   : > { %v405_v10 = vpop.f32.mrb[0].mxu0 }
 0x147   : > { %v406_v11 = vadd.f32 %v646_v9, %v405_v10  ;;  %v676_v12 = vpop.f32.mrb[1].mxu0 }
 0x149   : > { %v409_v13 = vmul.f32 %v406_v11, %v406_v11 }
 0x14b   : > { %v410_v14 = vmul.f32 0.035677407, %v409_v13 }
 0x14d   : > { %v411_v15 = vadd.f32 0.7978846, %v410_v14 }
 0x14f   : > { %v412_v16 = vmul.f32 %v411_v15, %v406_v11 }
 0x151   : > { %772 = vtanh.f32 %v412_v16 }
 0x15b   : > { %v773_v17 = vpop.eup %772 }
 0x15c   : > { %v414_v18 = vmul.f32 0.5, %v773_v17 }
 0x15e   : > { %v415_v19 = vadd.f32 0.5, %v414_v18 }
 0x160   : > { %v416_v20 = vmul.f32 %v415_v19, %v406_v11 }
 0x162   : > { %v417_v21 = vsel %vm335_vm1, %v416_v20, 0.0 }
 0x163   : > { %418 = vadd.xlane.f32.xlu0 %v417_v21 }
 0x1f0   : > { %v419_v22 = vpop.xlane.xlu0 %418 }
 0x1f1   : > { %v420_v23 = vmul.f32 0.03125, %v419_v22 }
 0x1f3   : > { %v421_v24 = vsub.f32 %v416_v20, %v420_v23 }
 0x1f5   : > { %v422_v25 = vmul.f32 %v421_v24, %v421_v24 }
 0x1f7   : > { %v423_v26 = vsel %vm335_vm1, %v422_v25, 0.0 }
 0x1f8   : > { %424 = vadd.xlane.f32.xlu0 %v423_v26 }
 0x285   : > { %v425_v33 = vpop.xlane.xlu0 %424 }
 0x286   : > { %v426_v34 = vmul.f32 0.03125, %v425_v33 }
 0x288   : > { %v427_v35 = vadd.f32 1e-12, %v426_v34 }
 0x28a   : > { %774 = vrsqrt.f32 %v427_v35 }
 0x294   : > { %v775_v36 = vpop.eup %774 }
 0x295   : > { %v429_v38 = vmul.f32 %v775_v36, %v421_v24 }
 0x297   : > { %v437_v40 = vmul.f32 %v648_v37, %v429_v38 }
 0x299   : > { %v445_v41 = vadd.f32 %v649_v39, %v437_v40 }
 0x29b   : > { %686 = vmatmul.mubr.msk.f32.vlgmr.msra.gmra.mrb[0].mxu1 %vm335_vm1, %v445_v41 }
 0x36e   : > { %v526_v43 = vpop.f32.mrb[0].mxu1 }
 0x36f   : > { %v527_v44 = vadd.f32 %v650_v42, %v526_v43  ;;  %v687_v45 = vpop.f32.mrb[1].mxu1 }
 0x371   : > { %530 = vst [vmem:[%s322_s19] sm:$0xff] %v527_v44 }
 0x372   : > { %875 = shalt.err (!%p872_p2)
}
 0x373   : > { %s876_s12 = scalar_lea.hbm %s1188_s9, 128  ;;  %s880_s21 = scalar_lea.hbm %s1239_s7, 256 }
 0x374   : > { %p877_p13 = scmp.ne.s32.totalorder %s1188_s9, %s876_s12  ;;  %p881_p4 = scmp.lt.u32.totalorder %s1188_s9, %s1239_s7 }
 0x375   : > { %p882_p5 = scmp.lt.u32.totalorder %s880_s21, %s876_s12  ;;  %p884_p11 = scmp.lt.u32.totalorder %s876_s12, %s1188_s9 }
 0x376   : > { %p878_p6 = pnand %p877_p13, %p1253_p0 }
 0x377   : > { %p883_p8 = por %p882_p5, %p881_p4 }
 0x378   : > { %p879_p10 = pneg %p878_p6 }
 0x379   : > { %p885_p1 = por %p884_p11, %p883_p8 }
 0x37b   : > { %p886_p3 = pnand %p885_p1, %p879_p10 }
 0x37d   : > { %889 = shalt.err (!%p886_p3)
}
 0x37e   : > { %710 = dma.vmem_to_hbm [thread:$0]  (%p1253_p0), %s1190_s23, 128, %s1188_s9, %s532_s20  }
 0x37f PF: > { %s557_s29 = sand.u32 1, %s920_s24   ;;  %p1254_p7 = scmp.ne.s32.totalorder %s1244_s8, 0 }
 0x380   : > { %p1255_p9 = scmp.ge.s32.totalorder %s932_s27, 2  ;;  %s558_s30 = scalar_lea.sflag [#allocation4], %s557_s29 }
 0x382   : > { %p724_p12 = pnand %p1255_p9, %p1254_p7 }
 0x384   : > { %915 = dma.done.wait (!%p724_p12), %s558_s30, 128  }
 0x385   : > { %917 = vsyncadd (!%p724_p12), %s558_s30, 4294967168  ;;  %p21_p2 = scmp.ge.s32.totalorder %s1093_s13, 4   ;;  %s1256_s24 = smov %s924_s25 }
 0x386   : > { %s1257_s25 = smov %s928_s26  ;;  %s1258_s26 = smov %s1109_s17 }
 0x387   : > { %s1259_s27 = smov %s1093_s13  ;;  %23 = sbr.rel (!%p21_p2) target bundleno = 6 (0x6), region = 101 }
 0x38e   :  { %563 = vsyncpa [#allocation3], 1 }
 0x38f   :  { %565 = vsyncpa [#allocation3 + $0x1], 1 }
 0x390   :  { %566 = vsyncpa [#allocation6], 1 }
 0x391   :  { %567 = vsyncpa [#allocation4], 1 }
 0x392   :  { %569 = vsyncpa [#allocation4 + $0x1], 1 }

</bundles_post_ra>
